<compile_context>
chip_gen: v7x
topology: tpu7x:2x2x1
jax: 0.10.0
libtpu: 0.0.40
codegen_flags: <defaults>
</compile_context>

<pallas_src>
import functools

import jax
import jax.numpy as jnp
from jax.experimental import pallas as pl
from jax.experimental.pallas import tpu as pltpu


def _round_up(a: int, b: int) -> int:
    return -(-a // b) * b


def _cdiv(a: int, b: int) -> int:
    return -(-a // b)


def _hadamard_kernel(x_ref, w_ref, o_ref):
    # x_ref / o_ref: (block_b, block_f); w_ref: (1, block_f) broadcast over rows.
    o_ref[...] = x_ref[...] * w_ref[...]


@functools.partial(jax.jit, static_argnames=("target_block_bytes",))
def hadamard_product(x: jax.Array, weights: jax.Array,
                     *, target_block_bytes: int = 4 << 20) -> jax.Array:
    """out = x * weights (broadcast over batch) via a lane-dense Pallas kernel.

    x:       (B, C, H, W)
    weights: (C, H, W)
    returns: (B, C, H, W)
    """
    B = x.shape[0]
    assert weights.shape == x.shape[1:], (x.shape, weights.shape)
    F = 1
    for d in weights.shape:
        F *= d

    itemsize = jnp.dtype(x.dtype).itemsize
    # Minimum sublane multiple for unmasked packed tiles: 8 f32, 16 bf16, 32 int8.
    min_sublane = max(8, 32 // itemsize)

    # Lane-dense feature block: multiple of 128, sized so a (min_sublane, block_f)
    # tile is ~target_block_bytes, capped at the 128-rounded feature extent.
    block_f = max(128, (target_block_bytes // (min_sublane * itemsize)) // 128 * 128)
    block_f = min(block_f, _round_up(F, 128))

    # Batch block: whole batch if it fits the per-block budget, else a multiple
    # of the dtype-aware minimum sublane count (ragged edge handled by Pallas).
    block_b = max(1, target_block_bytes // (block_f * itemsize))
    if block_b >= B:
        block_b = B
    else:
        block_b = max(min_sublane, (block_b // min_sublane) * min_sublane)

    # Megacore (v7x has 2 TCs): make sure at least one "parallel" axis has
    # extent >= 2 instead of running a degenerate (1, 1) grid.
    if _cdiv(F, block_f) * _cdiv(B, block_b) < 2:
        if block_f > 128:
            block_f = _round_up(_cdiv(block_f, 2), 128)
        elif B >= 2 * min_sublane:
            block_b = max(min_sublane, ((block_b // 2) // min_sublane) * min_sublane)

    # Flatten only (contiguous reshape, free). No padding: cdiv grid + masked
    # edge blocks keep HBM traffic at the minimum read-x + write-out.
    x2 = x.reshape(B, F)
    w2 = weights.reshape(1, F)

    # Batch innermost -> weights block index constant across inner steps
    # (weights strip stays resident in VMEM). Both axes independent/parallel.
    grid = (_cdiv(F, block_f), _cdiv(B, block_b))

    out2 = pl.pallas_call(
        _hadamard_kernel,
        out_shape=jax.ShapeDtypeStruct((B, F), x.dtype),
        grid_spec=pltpu.PrefetchScalarGridSpec(
            num_scalar_prefetch=0,
            grid=grid,
            in_specs=[
                pl.BlockSpec((block_b, block_f), lambda f, b: (b, f)),
                pl.BlockSpec((1, block_f), lambda f, b: (0, f)),
            ],
            out_specs=pl.BlockSpec((block_b, block_f), lambda f, b: (b, f)),
        ),
        compiler_params=pltpu.CompilerParams(
            dimension_semantics=("parallel", "parallel"),
            # ~17 MiB working set at 4 MiB blocks; 32 MiB clears v5e's 16 MiB
            # scoped default and is safe on v6e (128 MiB) / v7x (64 MiB) VMEM.
            vmem_limit_bytes=32 << 20,
        ),
        cost_estimate=pl.CostEstimate(
            flops=B * F,
            transcendentals=0,
            bytes_accessed=2 * B * F * itemsize + F * itemsize,
        ),
    )(x2, w2)

    return out2.reshape(x.shape)


if __name__ == "__main__":
    key = jax.random.PRNGKey(0)
    kx, kw = jax.random.split(key)

    B, C, H, W = 2, 4, 16, 16

    x = jax.random.normal(kx, (B, C, H, W), dtype=jnp.float32)
    # nn.Parameter(torch.rand(shape)) -> uniform [0, 1) init, shape = (C, H, W).
    weights = jax.random.uniform(kw, (C, H, W), dtype=jnp.float32)

    out = jax.block_until_ready(hadamard_product(x, weights))

    # Reference (plain JAX broadcasting, matches PyTorch semantics).
    ref = x * weights[None]
    assert out.shape == (B, C, H, W)
    assert jnp.allclose(out, ref, atol=1e-6, rtol=1e-6)

    print("KERNEL_OK")
</pallas_src>

<mosaic_0001>
module attributes {stable_mosaic.version = 11 : i64} {
  func.func @_hadamard_kernel(%arg0: i32, %arg1: i32, %arg2: memref<2x512xf32, #tpu.memory_space<vmem>>, %arg3: memref<1x512xf32, #tpu.memory_space<vmem>>, %arg4: memref<2x512xf32, #tpu.memory_space<vmem>>) attributes {dimension_semantics = [#tpu.dimension_semantics<parallel>, #tpu.dimension_semantics<parallel>], iteration_bounds = array<i64: 2, 1>, scalar_prefetch = 0 : i64, scratch_operands = 0 : i64, tpu.core_type = #tpu.core_type<tc>, window_params = [{transform_indices = @transform_0, window_bounds = array<i64: 2, 512>}, {transform_indices = @transform_1, window_bounds = array<i64: 1, 512>}, {transform_indices = @transform_2, window_bounds = array<i64: 2, 512>}]} {
    %c0 = arith.constant 0 : index
    %c0_0 = arith.constant 0 : index
    %0 = vector.load %arg2[%c0, %c0_0] : memref<2x512xf32, #tpu.memory_space<vmem>>, vector<2x512xf32>
    %c0_1 = arith.constant 0 : index
    %c0_2 = arith.constant 0 : index
    %1 = vector.load %arg3[%c0_1, %c0_2] : memref<1x512xf32, #tpu.memory_space<vmem>>, vector<1x512xf32>
    %2 = vector.broadcast %1 : vector<1x512xf32> to vector<2x512xf32>
    %3 = arith.mulf %0, %2 : vector<2x512xf32>
    %c0_3 = arith.constant 0 : index
    %c0_4 = arith.constant 0 : index
    %4 = vector.load %arg4[%c0_3, %c0_4] : memref<2x512xf32, #tpu.memory_space<vmem>>, vector<2x512xf32>
    tpu.vector_store %arg4[%c0_3, %c0_4], %3 {strides = array<i32>} : memref<2x512xf32, #tpu.memory_space<vmem>>, vector<2x512xf32>,
    return
  }
  func.func @transform_0(%arg0: i32, %arg1: i32) -> (i32, i32) {
    %c0_i32 = arith.constant 0 : i32
    return %arg1, %arg0 : i32, i32
  }
  func.func @transform_1(%arg0: i32, %arg1: i32) -> (i32, i32) {
    %c0_i32 = arith.constant 0 : i32
    %c0_i32_0 = arith.constant 0 : i32
    return %c0_i32, %arg0 : i32, i32
  }
  func.func @transform_2(%arg0: i32, %arg1: i32) -> (i32, i32) {
    %c0_i32 = arith.constant 0 : i32
    return %arg1, %arg0 : i32, i32
  }
}

</mosaic_0001>

<bundles_post_ra>
// kernel: hadamard_product.1
= control target key start
LH: loop header
LB: loop body
LE: loop exit
PB: predicated region body
PF: predicated region fallthrough
CT: control target
= control target key end

     0   :  { %s414_s9 = smov 0   ;;  %s416_s10 = smov 0   ;;  %s450_s0 = inlined_call_operand.vmem [shape: f32[2,1024], index: 0, kind: input, shape index: {}]   ;;  %s451_s1 = inlined_call_operand.vmem [shape: f32[1,1024], index: 1, kind: input, shape index: {}]   ;;  %s452_s2 = inlined_call_operand.vmem [shape: f32[2,1024], index: 2, kind: output, shape index: {}]  }
   0x1   :  { %s418_s11 = smov 0  }
   0x2 LB: > { %s24_s12 = sadd.s32 1, %s392_s10  ;;  %p341_p0 = scmp.ge.s32.totalorder %s396_s11, 1  ;;  %s396_s11 = sphi %s418_s11, %s12_s11   ;;  %s392_s10 = sphi %s416_s10, %s454_s10   ;;  %s388_s9 = sphi %s414_s9, %s453_s9  }
   0x3   : > { %p26_p1 = scmp.ge.s32.totalorder %s24_s12, 2  ;;  %p143_p2 = scmp.lt.s32.totalorder %s396_s11, 3 }
   0x5   : > { %s456_s12 = smov (%p26_p1, %s24_s12), 0  ;;  %p144_p3 = pnand %p341_p0, %p143_p2 }
   0x6   : > { %s342_s13 = sshll.u32 (!%p144_p3), %s388_s9, 2  ;;  %v205_v0 = vlaneseq (!%p144_p3)  ;;  %v398_v1 = vmov (!%p144_p3), 1983009808  }
   0x7   : > { %147 = sbr.rel (%p144_p3) target bundleno = 28 (0x1c), region = 28  ;;  %p180_p4 = scmp.lt.s32.totalorder (!%p144_p3), %s342_s13, 7  ;;  %v224_v2 = vunpack.c.l.s4 (!%p144_p3), %v398_v1 }
   0x8   : > { %v206_v3 = vshrl.u32 (!%p144_p3), %v205_v0, 7 }
   0x9   : > { %v225_v4 = vunpack.c.0.s8 (!%p144_p3), %v224_v2 }
   0xa   : > { %v207_v5 = vsub.s32 (!%p144_p3), 0, %v206_v3  ;;  %v211_v6 = vsub.s32 (!%p144_p3), 1, %v206_v3  ;;  %v215_v7 = vsub.s32 (!%p144_p3), 2, %v206_v3  ;;  %v219_v8 = vsub.s32 (!%p144_p3), 3, %v206_v3 }
   0xb   : > { %v228_v10 = vsub.s32 (!%p144_p3), %v225_v4, %v206_v3 }
   0xe   : > { %s458_s13 = smov (!%p180_p4, %s342_s13), 7 }
   0xf   : > { %s190_s16 = scalar_lea.vmem %s451_s1, %s458_s13  ;;  %s343_s17 = sshll.u32 %s458_s13, 1 }
  0x10   : > { %v203_v9 = vld [vmem:[%s190_s16] sm:$0xf]  ;;  %s185_s20 = scalar_lea.vmem %s450_s0, %s343_s17  ;;  %s200_s23 = scalar_lea.vmem %s452_s2, %s343_s17 }
  0x11   : > { %v208_v11 = vrot.slane %v203_v9, %v207_v5  ;;  %v212_v12 = vrot.slane %v203_v9, %v211_v6  ;;  %v216_v13 = vrot.slane %v203_v9, %v215_v7  ;;  %v220_v14 = vrot.slane %v203_v9, %v219_v8  ;;  %v202_v19 = vld [vmem:[%s185_s20] sm:$0xff] }
  0x13   : > { %v221_v15 = vcombine.low %v208_v11, %v212_v12  ;;  %v222_v16 = vcombine.low %v216_v13, %v220_v14 }
  0x15   : > { %v229_v17 = vrot.slane %v221_v15, %v228_v10  ;;  %v236_v18 = vrot.slane %v222_v16, %v228_v10 }
  0x17   : > { %v237_v20 = vcombine.low %v229_v17, %v236_v18 }
  0x19   : > { %v239_v21 = vmul.f32 %v237_v20, %v202_v19 }
  0x1b   : > { %240 = vst [vmem:[%s200_s23] sm:$0xff] %v239_v21 }
  0x1c PF: > { %s12_s11 = sadd.s32 1, %s396_s11   ;;  %s453_s9 = smov %s392_s10 }
  0x1d   : > { %p9_p5 = scmp.ge.s32.totalorder %s12_s11, 4   ;;  %s454_s10 = smov %s456_s12 }
  0x1f   :  { %11 = sbr.rel (!%p9_p5) target bundleno = 2 (0x2), region = 61 }

</bundles_post_ra>
